<compile_context>
chip_gen: v6e
topology: v6e:2x2x1
jax: 0.10.0
libtpu: 0.0.40
codegen_flags: <defaults>
</compile_context>

<pallas_src>
import functools

import jax
import jax.numpy as jnp
from jax.experimental import pallas as pl
from jax.experimental.pallas import tpu as pltpu


def _layernorm_kernel(x_ref, a_ref, b_ref, o_ref, *, eps: float):
    x = x_ref[...].astype(jnp.float32)                  # (tn, D)
    d = x.shape[-1]

    mu = jnp.mean(x, axis=-1, keepdims=True)            # (tn, 1)
    diff = x - mu
    # torch.std default is unbiased (divide by D - 1).
    var = jnp.sum(diff * diff, axis=-1, keepdims=True) / (d - 1)
    gamma = jnp.sqrt(var)                                # (tn, 1)

    # One reciprocal per row (EUP) instead of a per-element VALU divide.
    inv = pl.reciprocal(gamma + eps, approx=False)       # (tn, 1)

    a = a_ref[...].astype(jnp.float32)                   # (1, D)
    b = b_ref[...].astype(jnp.float32)                   # (1, D)
    out = diff * inv * a + b
    o_ref[...] = out.astype(o_ref.dtype)


def _pick_row_tile(n: int, d: int, itemsize: int,
                   target_block_bytes: int = 4 * 1024 * 1024) -> int:
    """Largest row tile (multiple of 8) whose (tn, D) block fits the budget."""
    bytes_per_row = max(d * itemsize, 1)
    tn = max(8, (target_block_bytes // bytes_per_row) // 8 * 8)
    if tn >= n:
        return n          # single full-extent block (allowed even if n % 8 != 0)
    return tn


def layer_normalization(x, a, b, *, eps: float = 0.001):
    """Pallas implementation of LayerNormalization.forward.

    x: [N, D]   a, b: [D]
    """
    assert x.ndim == 2, "input must be 2-D"
    n, d = x.shape
    if d == 1:
        # PyTorch module early-returns x when the last dim is 1.
        return x

    itemsize = jnp.dtype(x.dtype).itemsize
    tn = _pick_row_tile(n, d, itemsize)
    grid = (pl.cdiv(n, tn),)

    a2 = a.reshape(1, d)
    b2 = b.reshape(1, d)

    # Scoped-VMEM budget: double-buffered input + output blocks, plus the small
    # resident a/b parameter blocks, with 2x headroom; capped at 32 MiB.
    block_bytes = tn * d * itemsize
    param_bytes = 2 * (d * jnp.dtype(a.dtype).itemsize)
    need = 2 * (2 * block_bytes) + 2 * param_bytes
    vmem_limit = int(min(max(2 * need, 16 * 1024 * 1024), 32 * 1024 * 1024))

    kernel = functools.partial(_layernorm_kernel, eps=eps)

    return pl.pallas_call(
        kernel,
        out_shape=jax.ShapeDtypeStruct((n, d), x.dtype),
        grid_spec=pltpu.PrefetchScalarGridSpec(
            num_scalar_prefetch=0,
            grid=grid,
            in_specs=[
                pl.BlockSpec((tn, d), lambda i: (i, 0)),   # x row tile
                pl.BlockSpec((1, d), lambda i: (0, 0)),    # scale a (resident)
                pl.BlockSpec((1, d), lambda i: (0, 0)),    # shift b (resident)
            ],
            out_specs=pl.BlockSpec((tn, d), lambda i: (i, 0)),
        ),
        compiler_params=pltpu.CompilerParams(
            dimension_semantics=("parallel",),
            vmem_limit_bytes=vmem_limit,
        ),
    )(x, a2, b2)


def _reference(x, a, b, eps):
    d = x.shape[-1]
    mu = jnp.mean(x, axis=-1, keepdims=True)
    gamma = jnp.sqrt(jnp.sum((x - mu) ** 2, axis=-1, keepdims=True) / (d - 1))
    return (x - mu) / (gamma + eps) * a + b


if __name__ == "__main__":
    key = jax.random.PRNGKey(0)
    eps = 0.001

    # Small shapes consistent with the module's 2-D [N, d_dim] input.
    N, D = 8, 32
    k1, k2 = jax.random.split(key)
    x = jax.random.normal(k1, (N, D), dtype=jnp.float32)
    a = jnp.ones((D,), dtype=jnp.float32)     # matches nn.Parameter(torch.ones(d_dim))
    b = jnp.zeros((D,), dtype=jnp.float32)    # matches nn.Parameter(torch.zeros(d_dim))

    out = jax.block_until_ready(layer_normalization(x, a, b, eps=eps))
    ref = _reference(x, a, b, eps)
    assert jnp.allclose(out, ref, atol=1e-5, rtol=1e-5), "mismatch vs reference"

    # Exercise the cdiv / partial-block path with a non-multiple-of-8 row count.
    N2 = 37
    x2 = jax.random.normal(k2, (N2, D), dtype=jnp.float32)
    out2 = jax.block_until_ready(layer_normalization(x2, a, b, eps=eps))
    ref2 = _reference(x2, a, b, eps)
    assert jnp.allclose(out2, ref2, atol=1e-5, rtol=1e-5), "mismatch vs reference (odd N)"

    print("KERNEL_OK")
</pallas_src>

<mosaic_0001>
module attributes {stable_mosaic.version = 11 : i64} {
  func.func @_layernorm_kernel(%arg0: i32, %arg1: memref<8x32xf32, #tpu.memory_space<vmem>>, %arg2: memref<1x32xf32, #tpu.memory_space<vmem>>, %arg3: memref<1x32xf32, #tpu.memory_space<vmem>>, %arg4: memref<8x32xf32, #tpu.memory_space<vmem>>) attributes {dimension_semantics = [#tpu.dimension_semantics<parallel>], iteration_bounds = array<i64: 1>, scalar_prefetch = 0 : i64, scratch_operands = 0 : i64, tpu.core_type = #tpu.core_type<tc>, window_params = [{transform_indices = @transform_0, window_bounds = array<i64: 8, 32>}, {pipeline_mode = #tpu.pipeline_mode<synchronous>, transform_indices = @transform_1, window_bounds = array<i64: 1, 32>}, {pipeline_mode = #tpu.pipeline_mode<synchronous>, transform_indices = @transform_2, window_bounds = array<i64: 1, 32>}, {transform_indices = @transform_3, window_bounds = array<i64: 8, 32>}]} {
    %c0 = arith.constant 0 : index
    %c0_0 = arith.constant 0 : index
    %0 = vector.load %arg1[%c0, %c0_0] : memref<8x32xf32, #tpu.memory_space<vmem>>, vector<8x32xf32>
    %cst = arith.constant dense<0.000000e+00> : vector<8xf32>
    %1 = vector.multi_reduction <add>, %0, %cst [1] : vector<8x32xf32> to vector<8xf32>
    %2 = vector.shape_cast %1 : vector<8xf32> to vector<8x1xf32>
    %cst_1 = arith.constant 3.200000e+01 : f32
    %3 = vector.broadcast %cst_1 : f32 to vector<8x1xf32>
    %4 = arith.divf %2, %3 : vector<8x1xf32>
    %5 = vector.broadcast %4 : vector<8x1xf32> to vector<8x32xf32>
    %6 = arith.subf %0, %5 : vector<8x32xf32>
    %7 = arith.mulf %6, %6 : vector<8x32xf32>
    %cst_2 = arith.constant dense<0.000000e+00> : vector<8xf32>
    %8 = vector.multi_reduction <add>, %7, %cst_2 [1] : vector<8x32xf32> to vector<8xf32>
    %9 = vector.shape_cast %8 : vector<8xf32> to vector<8x1xf32>
    %cst_3 = arith.constant 3.100000e+01 : f32
    %10 = vector.broadcast %cst_3 : f32 to vector<8x1xf32>
    %11 = arith.divf %9, %10 : vector<8x1xf32>
    %12 = math.sqrt %11 : vector<8x1xf32>
    %cst_4 = arith.constant 1.000000e-03 : f32
    %13 = vector.broadcast %cst_4 : f32 to vector<8x1xf32>
    %14 = arith.addf %12, %13 : vector<8x1xf32>
    %15 = tpu.reciprocal %14 : vector<8x1xf32> -> vector<8x1xf32>
    %c0_5 = arith.constant 0 : index
    %c0_6 = arith.constant 0 : index
    %16 = vector.load %arg2[%c0_5, %c0_6] : memref<1x32xf32, #tpu.memory_space<vmem>>, vector<1x32xf32>
    %c0_7 = arith.constant 0 : index
    %c0_8 = arith.constant 0 : index
    %17 = vector.load %arg3[%c0_7, %c0_8] : memref<1x32xf32, #tpu.memory_space<vmem>>, vector<1x32xf32>
    %18 = vector.broadcast %15 : vector<8x1xf32> to vector<8x32xf32>
    %19 = arith.mulf %6, %18 : vector<8x32xf32>
    %20 = vector.broadcast %16 : vector<1x32xf32> to vector<8x32xf32>
    %21 = arith.mulf %19, %20 : vector<8x32xf32>
    %22 = vector.broadcast %17 : vector<1x32xf32> to vector<8x32xf32>
    %23 = arith.addf %21, %22 : vector<8x32xf32>
    %c0_9 = arith.constant 0 : index
    %c0_10 = arith.constant 0 : index
    %24 = vector.load %arg4[%c0_9, %c0_10] : memref<8x32xf32, #tpu.memory_space<vmem>>, vector<8x32xf32>
    tpu.vector_store %arg4[%c0_9, %c0_10], %23 {strides = array<i32>} : memref<8x32xf32, #tpu.memory_space<vmem>>, vector<8x32xf32>,
    return
  }
  func.func @transform_0(%arg0: i32) -> (i32, i32) {
    %c0_i32 = arith.constant 0 : i32
    %c0_i32_0 = arith.constant 0 : i32
    return %arg0, %c0_i32 : i32, i32
  }
  func.func @transform_1(%arg0: i32) -> (i32, i32) {
    %c0_i32 = arith.constant 0 : i32
    %c0_i32_0 = arith.constant 0 : i32
    %c0_i32_1 = arith.constant 0 : i32
    return %c0_i32, %c0_i32_0 : i32, i32
  }
  func.func @transform_2(%arg0: i32) -> (i32, i32) {
    %c0_i32 = arith.constant 0 : i32
    %c0_i32_0 = arith.constant 0 : i32
    %c0_i32_1 = arith.constant 0 : i32
    return %c0_i32, %c0_i32_0 : i32, i32
  }
  func.func @transform_3(%arg0: i32) -> (i32, i32) {
    %c0_i32 = arith.constant 0 : i32
    %c0_i32_0 = arith.constant 0 : i32
    return %arg0, %c0_i32 : i32, i32
  }
}

</mosaic_0001>

<bundles_post_ra>
// kernel: tpu_custom_call.1
= control target key start
LH: loop header
LB: loop body
LE: loop exit
PB: predicated region body
PF: predicated region fallthrough
CT: control target
= control target key end

     0   :  { %8 = vsyncpa [#allocation3], 0  ;;  %s172_s0 = inlined_call_operand.hbm [shape: f32[8,32], index: 0, kind: input, shape index: {}]   ;;  %s173_s1 = inlined_call_operand.vmem [shape: f32[1,32], index: 1, kind: input, shape index: {}]   ;;  %s174_s2 = inlined_call_operand.vmem [shape: f32[1,32], index: 2, kind: input, shape index: {}]   ;;  %s175_s3 = inlined_call_operand.hbm [shape: f32[8,32], index: 3, kind: output, shape index: {}]  }
   0x1   :  { %9 = vsyncpa [#allocation4], 0  ;;  %s135_s12 = smov [#allocation2]  }
   0x2   :  { %s16_s13 = sshll.u32 %s135_s12, 4  ;;  %s17_s13 = int_to_ptr.vmem [resolvable:$true] %s16_s13 }
   0x3   :  { %s99_s14 = scalar_lea.vmem %s17_s13, 128  ;;  %p104_p1 = scmp.lt.s32.totalorder %s17_s13, %s17_s13 }
   0x4   :  { %p100_p0 = scmp.ne.s32.totalorder %s17_s13, %s99_s14  ;;  %p105_p2 = scmp.lt.s32.totalorder %s99_s14, %s99_s14 }
   0x6   :  { %p106_p3 = por %p105_p2, %p104_p1 }
   0x8   :  { %p107_p4 = pnand %p106_p3, %p100_p0 }
   0xa   :  { %110 = shalt.err (!%p107_p4)
}
   0xb   :  { %19 = dma.hbm_to_vmem [thread:$0]  %s172_s0, 128, %s17_s13, [#allocation3]  }
   0xc   :  { %131 = dma.done.wait [#allocation3], 128  }
   0xd   :  { %132 = vsyncadd [#allocation3], 4294967168  ;;  %vm28_vm0 = vcmask 261120   ;;  %v27_v0 = vld [vmem:[#allocation2] sm:$0xff]  ;;  %s136_s20 = smov [#allocation5]  }
   0xe   :  { %v29_v1 = vsel %vm28_vm0, %v27_v0, 0.0  ;;  %v83_v16 = vld [vmem:[%s173_s1] ss:$0 sm:$0xff]  ;;  %s74_s21 = sshll.u32 %s136_s20, 4  ;;  %s75_s21 = int_to_ptr.vmem [resolvable:$true] %s74_s21 }
   0xf   :  { %30 = vadd.xlane.f32.xlu0 %v29_v1  ;;  %v84_v18 = vld [vmem:[%s174_s2] ss:$0 sm:$0xff]  ;;  %s111_s22 = scalar_lea.vmem %s75_s21, 128  ;;  %p116_p6 = scmp.lt.s32.totalorder %s75_s21, %s75_s21 }
  0x10   :  { %p112_p5 = scmp.ne.s32.totalorder %s75_s21, %s111_s22  ;;  %p117_p7 = scmp.lt.s32.totalorder %s111_s22, %s111_s22 }
  0x12   :  { %p118_p8 = por %p117_p7, %p116_p6 }
  0x14   :  { %p119_p9 = pnand %p118_p8, %p112_p5 }
  0x98   :  { %v31_v2 = vpop.xlane.xlu0 %30 }
  0x99   :  { %v33_v3 = vmul.f32 0.03125, %v31_v2 }
  0x9b   :  { %v34_v4 = vsub.f32 %v27_v0, %v33_v3 }
  0x9d   :  { %v35_v5 = vmul.f32 %v34_v4, %v34_v4 }
  0x9f   :  { %v36_v6 = vsel %vm28_vm0, %v35_v5, 0.0 }
  0xa0   :  { %37 = vadd.xlane.f32.xlu0 %v36_v6 }
 0x129   :  { %v38_v7 = vpop.xlane.xlu0 %37 }
 0x12a   :  { %v40_v8 = vmul.f32 0.032258064, %v38_v7 }
 0x12c   :  { %87 = vrsqrt.f32 %v40_v8  ;;  %vm43_vm1 = vcmp.eq.f32.partialorder %v40_v8, inf  ;;  %v46_v11 = vand.u32 2147483648, %v40_v8  ;;  %vm45_vm2 = vcmp.eq.f32.partialorder %v40_v8, 0.0 }
 0x139   :  { %v88_v9 = vpop.eup %87 }
 0x13a   :  { %v42_v10 = vmul.f32 %v88_v9, %v40_v8 }
 0x13c   :  { %v44_v12 = vsel %vm43_vm1, %v40_v8, %v42_v10 }
 0x13d   :  { %v47_v13 = vsel %vm45_vm2, %v46_v11, %v44_v12 }
 0x13e   :  { %v48_v14 = vadd.f32 0.001, %v47_v13 }
 0x140   :  { %89 = vrcp.f32 %v48_v14 }
 0x14d   :  { %v90_v15 = vpop.eup %89 }
 0x14e   :  { %v52_v17 = vmul.f32 %v90_v15, %v34_v4 }
 0x150   :  { %v59_v19 = vmul.f32 %v83_v16, %v52_v17 }
 0x152   :  { %v66_v20 = vadd.f32 %v84_v18, %v59_v19 }
 0x154   :  { %67 = vst.msk [vmem:[#allocation5] sm:$0xff] %vm28_vm0, %v66_v20 }
 0x155   :  { %122 = shalt.err (!%p119_p9)
}
 0x156   :  { %77 = dma.vmem_to_hbm [thread:$0]  %s75_s21, 128, %s175_s3, [#allocation4]  }
 0x157   :  { %133 = dma.done.wait [#allocation4], 128  }
 0x158   :  { %134 = vsyncadd [#allocation4], 4294967168 }
 0x159   :  { %81 = vsyncpa [#allocation3], 1 }
 0x15a   :  { %82 = vsyncpa [#allocation4], 1 }

</bundles_post_ra>
